<compile_context>
chip_gen: v7x
topology: tpu7x:2x2x1
jax: 0.10.0
libtpu: 0.0.40
codegen_flags: <defaults>
</compile_context>

<pallas_src>
import jax
import jax.numpy as jnp
from jax.experimental import pallas as pl
from jax.experimental.pallas import tpu as pltpu

VOCAB = 10          # embedding rows
DIM = 3             # embedding dim
V_PAD = 128         # vocab padded to a full lane width
D_PAD = 128         # embedding dim padded to a full lane width


def whisper_decoder_kernel(idx_ref, w_ref, out_ref):
    # idx_ref : (N_PAD, 1)      int32 in VMEM (token ids, zero padded)
    # w_ref   : (V_PAD, D_PAD)  f32 in VMEM (zero-padded embedding weight)
    # out_ref : (N_PAD, V_PAD)  f32 in VMEM (lane-dense logits)
    n_pad = idx_ref.shape[0]
    v_pad = w_ref.shape[0]

    # One-hot selector built with a single vectorized compare (VPU).
    lane_ids = jax.lax.broadcasted_iota(jnp.int32, (n_pad, v_pad), 1)
    onehot = (lane_ids == idx_ref[...]).astype(jnp.float32)         # (N_PAD, V_PAD)

    # Embedding gather as an MXU matmul: x = onehot @ W_pad.
    x = jnp.dot(onehot, w_ref[...], preferred_element_type=jnp.float32)  # (N_PAD, D_PAD)

    # Tied projection: logits = x @ W_pad.T.
    out_ref[...] = jnp.dot(x, w_ref[...].T, preferred_element_type=jnp.float32)


def whisper_decoder_forward(idx, weight):
    """idx: (B, T) int ids in [0, VOCAB); weight: (VOCAB, DIM) f32.
    Returns (B, T, VOCAB) f32 logits."""
    B, T = idx.shape
    N = B * T
    n_pad = max(8, ((N + 7) // 8) * 8)   # sublane-aligned token count

    # Token ids -> (N_PAD, 1) int32 column, zero padded (padding rows compute
    # logits for token 0 and are sliced away below).
    idx_col = jnp.zeros((n_pad, 1), jnp.int32).at[:N, 0].set(
        idx.reshape(-1).astype(jnp.int32)
    )

    # Zero-padded lane-dense weight tile.
    w_padded = jnp.zeros((V_PAD, D_PAD), jnp.float32).at[:VOCAB, :DIM].set(
        weight.astype(jnp.float32)
    )

    out = pl.pallas_call(
        whisper_decoder_kernel,
        out_shape=jax.ShapeDtypeStruct((n_pad, V_PAD), jnp.float32),
        grid_spec=pl.GridSpec(
            grid=(1,),
            in_specs=[
                pl.BlockSpec((n_pad, 1), lambda i: (0, 0)),
                pl.BlockSpec((V_PAD, D_PAD), lambda i: (0, 0)),
            ],
            out_specs=pl.BlockSpec((n_pad, V_PAD), lambda i: (0, 0)),
        ),
        compiler_params=pltpu.CompilerParams(
            dimension_semantics=("arbitrary",)
        ),
    )(idx_col, w_padded)

    return out[:N, :VOCAB].reshape(B, T, VOCAB)


if __name__ == "__main__":
    key = jax.random.PRNGKey(0)
    k_w, k_idx = jax.random.split(key)

    # Deterministic parameter init (matches nn.Embedding(10, 3) shape; N(0,1)).
    weight = jax.random.normal(k_w, (VOCAB, DIM), dtype=jnp.float32)

    # Example input: batch=2, seq=8 token ids in [0, 10).
    idx = jax.random.randint(k_idx, (2, 8), 0, VOCAB, dtype=jnp.int32)

    out = whisper_decoder_forward(idx, weight)
    out = jax.block_until_ready(out)

    # Pure-JAX reference check.
    x_ref = weight[idx]            # (2, 8, 3)
    ref = x_ref @ weight.T         # (2, 8, 10)
    assert out.shape == (2, 8, VOCAB)
    assert jnp.allclose(out, ref, atol=1e-5, rtol=1e-5), "mismatch vs reference"

    print("KERNEL_OK")
</pallas_src>

<mosaic_0001>
module attributes {stable_mosaic.version = 11 : i64} {
  func.func @whisper_decoder_kernel(%arg0: i32, %arg1: memref<16x1xi32, #tpu.memory_space<vmem>>, %arg2: memref<128x128xf32, #tpu.memory_space<vmem>>, %arg3: memref<16x128xf32, #tpu.memory_space<vmem>>) attributes {dimension_semantics = [#tpu.dimension_semantics<arbitrary>], iteration_bounds = array<i64: 1>, scalar_prefetch = 0 : i64, scratch_operands = 0 : i64, tpu.core_type = #tpu.core_type<tc>, window_params = [{pipeline_mode = #tpu.pipeline_mode<synchronous>, transform_indices = @transform_0, window_bounds = array<i64: 16, 1>}, {pipeline_mode = #tpu.pipeline_mode<synchronous>, transform_indices = @transform_1, window_bounds = array<i64: 128, 128>}, {pipeline_mode = #tpu.pipeline_mode<synchronous>, transform_indices = @transform_2, window_bounds = array<i64: 16, 128>}]} {
    %0 = tpu.iota {dimensions = array<i32: 1>} : vector<16x128xi32>
    %c0 = arith.constant 0 : index
    %c0_0 = arith.constant 0 : index
    %1 = vector.load %arg1[%c0, %c0_0] : memref<16x1xi32, #tpu.memory_space<vmem>>, vector<16x1xi32>
    %2 = vector.broadcast %1 : vector<16x1xi32> to vector<16x128xi32>
    %3 = arith.cmpi eq, %0, %2 : vector<16x128xi32>
    %4 = arith.extui %3 : vector<16x128xi1> to vector<16x128xi32>
    %5 = arith.sitofp %4 : vector<16x128xi32> to vector<16x128xf32>
    %c0_1 = arith.constant 0 : index
    %c0_2 = arith.constant 0 : index
    %6 = vector.load %arg2[%c0_1, %c0_2] : memref<128x128xf32, #tpu.memory_space<vmem>>, vector<128x128xf32>
    %cst = arith.constant dense<0.000000e+00> : vector<16x128xf32>
    %7 = tpu.matmul %5, %6, %cst {dimension_numbers = #tpu.dot_dimension_numbers<[1], [0], [0], [1], [0, 0, 1, 1], [], []>} : vector<16x128xf32>, vector<128x128xf32>, vector<16x128xf32> -> vector<16x128xf32>
    %c0_3 = arith.constant 0 : index
    %c0_4 = arith.constant 0 : index
    %8 = vector.load %arg2[%c0_3, %c0_4] : memref<128x128xf32, #tpu.memory_space<vmem>>, vector<128x128xf32>
    %9 = tpu.transpose %8, [1, 0] : vector<128x128xf32> -> vector<128x128xf32>
    %cst_5 = arith.constant dense<0.000000e+00> : vector<16x128xf32>
    %10 = tpu.matmul %7, %9, %cst_5 {dimension_numbers = #tpu.dot_dimension_numbers<[1], [0], [0], [1], [0, 0, 1, 1], [], []>} : vector<16x128xf32>, vector<128x128xf32>, vector<16x128xf32> -> vector<16x128xf32>
    %c0_6 = arith.constant 0 : index
    %c0_7 = arith.constant 0 : index
    %11 = vector.load %arg3[%c0_6, %c0_7] : memref<16x128xf32, #tpu.memory_space<vmem>>, vector<16x128xf32>
    tpu.vector_store %arg3[%c0_6, %c0_7], %10 {strides = array<i32>} : memref<16x128xf32, #tpu.memory_space<vmem>>, vector<16x128xf32>,
    return
  }
  func.func @transform_0(%arg0: i32) -> (i32, i32) {
    %c0_i32 = arith.constant 0 : i32
    %c0_i32_0 = arith.constant 0 : i32
    %c0_i32_1 = arith.constant 0 : i32
    return %c0_i32, %c0_i32_0 : i32, i32
  }
  func.func @transform_1(%arg0: i32) -> (i32, i32) {
    %c0_i32 = arith.constant 0 : i32
    %c0_i32_0 = arith.constant 0 : i32
    %c0_i32_1 = arith.constant 0 : i32
    return %c0_i32, %c0_i32_0 : i32, i32
  }
  func.func @transform_2(%arg0: i32) -> (i32, i32) {
    %c0_i32 = arith.constant 0 : i32
    %c0_i32_0 = arith.constant 0 : i32
    %c0_i32_1 = arith.constant 0 : i32
    return %c0_i32, %c0_i32_0 : i32, i32
  }
}

</mosaic_0001>

<bundles_post_ra>
// kernel: tpu_custom_call.1
= control target key start
LH: loop header
LB: loop body
LE: loop exit
PB: predicated region body
PF: predicated region fallthrough
CT: control target
= control target key end

     0   :  { %7 = vsyncpa [#allocation3], 0  ;;  %s513_s0 = inlined_call_operand.vmem [shape: s32[16,1], index: 0, kind: input, shape index: {}]   ;;  %s514_s1 = inlined_call_operand.hbm [shape: f32[128,128], index: 1, kind: input, shape index: {}]   ;;  %s515_s2 = inlined_call_operand.hbm [shape: f32[16,128], index: 2, kind: output, shape index: {}]  }
   0x1   :  { %8 = vsyncpa [#allocation4], 0  ;;  %s456_s9 = smov [#allocation2]   ;;  %s408_s13 = scalar_lea.hbm %s514_s1, 2048 }
   0x2   :  { %s16_s10 = sshll.u32 %s456_s9, 4  ;;  %p409_p0 = scmp.ne.s32.totalorder %s514_s1, %s408_s13  ;;  %s17_s10 = int_to_ptr.vmem [resolvable:$true] %s16_s10 }
   0x3   :  { %p412_p1 = scmp.lt.u32.totalorder %s408_s13, %s514_s1 }
   0x5   :  { %p414_p2 = pnand %p412_p1, %p409_p0 }
   0x7   :  { %417 = shalt.err (!%p414_p2)
}
   0x8   :  { %s418_s18 = scalar_lea.vmem %s17_s10, 2048  ;;  %p423_p4 = scmp.lt.s32.totalorder %s17_s10, %s17_s10 }
   0x9   :  { %p419_p3 = scmp.ne.s32.totalorder %s17_s10, %s418_s18  ;;  %p424_p5 = scmp.lt.s32.totalorder %s418_s18, %s418_s18 }
   0xb   :  { %p425_p6 = por %p424_p5, %p423_p4 }
   0xd   :  { %p426_p7 = pnand %p425_p6, %p419_p3 }
   0xf   :  { %429 = shalt.err (!%p426_p7)
}
  0x10   :  { %s457_s19 = smov 128   ;;  %s458_s20 = smov 8  }
  0x11   :  { %22 = dma.hbm_to_vmem [thread:$0]  %s514_s1, 2048, %s17_s10, [#allocation3], %s457_s19, %s457_s19, %s458_s20  }
  0x12   :  { %452 = dma.done.wait [#allocation3], 2048  }
  0x13   :  { %453 = vsyncadd [#allocation3], 4294965248  ;;  %v459_v0 = vmov 0   ;;  %v28_v1 = vld [vmem:[%s513_s0] sm:$0xff]  ;;  %v43_v3 = vld [vmem:[#allocation2 + $0x8] sm:$0xff]  ;;  %v26_v27 = vlaneseq  ;;  %v460_v30 = vmov 1.0  }
  0x14   :  { %407 = vset.pattern.permute.xlu0 %v459_v0  ;;  %v42_v2 = vld [vmem:[#allocation2] sm:$0xff]  ;;  %v44_v4 = vld [vmem:[#allocation2 + $0x10] sm:$0xff]  ;;  %v45_v5 = vld [vmem:[#allocation2 + $0x18] sm:$0xff] }
  0x15   :  { %31 = vperm.xlu0 %407, %v28_v1   ;;  %v29_v6 = vld [vmem:[%s513_s0 + $0x8] sm:$0xff]  ;;  %v337_v7 = vpack.c.bf16 %v43_v3, %v42_v2  ;;  %v341_v8 = vpack.c.bf16 %v45_v5, %v44_v4  ;;  %v46_v9 = vld [vmem:[#allocation2 + $0x20] sm:$0xff]  ;;  %v48_v12 = vld [vmem:[#allocation2 + $0x30] sm:$0xff]  ;;  %v27_v28 = vand.u32 127, %v26_v27  ;;  %s461_s0 = smov [#allocation5]  }
  0x16   :  { %v47_v10 = vld [vmem:[#allocation2 + $0x28] sm:$0xff]  ;;  %v49_v13 = vld [vmem:[#allocation2 + $0x38] sm:$0xff]  ;;  %v50_v15 = vld [vmem:[#allocation2 + $0x40] sm:$0xff]  ;;  %s215_s1 = sshll.u32 %s461_s0, 4  ;;  %s216_s1 = int_to_ptr.vmem [resolvable:$true] %s215_s1 }
  0x17   :  { %338 = vmatprep.subr.bf16.mxu0 %v337_v7  ;;  %370 = vmatprep.subr.bf16.mxu1 %v337_v7  ;;  %v345_v11 = vpack.c.bf16 %v47_v10, %v46_v9  ;;  %v349_v14 = vpack.c.bf16 %v49_v13, %v48_v12  ;;  %v51_v16 = vld [vmem:[#allocation2 + $0x48] sm:$0xff]  ;;  %v52_v18 = vld [vmem:[#allocation2 + $0x50] sm:$0xff]  ;;  %v53_v19 = vld [vmem:[#allocation2 + $0x58] sm:$0xff]  ;;  %s430_s27 = scalar_lea.vmem %s216_s1, 256  ;;  %p435_p9 = scmp.lt.s32.totalorder %s216_s1, %s216_s1 }
  0x18   :  { %340 = vmatpush3.bf16.msra.mxu0 %v337_v7  ;;  %372 = vmatpush3.bf16.xpose.msra.mxu1 %v337_v7  ;;  %v353_v17 = vpack.c.bf16 %v51_v16, %v50_v15  ;;  %v357_v20 = vpack.c.bf16 %v53_v19, %v52_v18  ;;  %v54_v21 = vld [vmem:[#allocation2 + $0x60] sm:$0xff]  ;;  %v55_v22 = vld [vmem:[#allocation2 + $0x68] sm:$0xff]  ;;  %v56_v24 = vld [vmem:[#allocation2 + $0x70] sm:$0xff]  ;;  %p431_p8 = scmp.ne.s32.totalorder %s216_s1, %s430_s27  ;;  %p436_p10 = scmp.lt.s32.totalorder %s430_s27, %s430_s27 }
  0x19   :  { %34 = vperm.xlu0 %407, %v29_v6   ;;  %342 = vmatprep.subr.bf16.mxu0 %v341_v8  ;;  %v361_v23 = vpack.c.bf16 %v55_v22, %v54_v21  ;;  %v57_v25 = vld [vmem:[#allocation2 + $0x78] sm:$0xff] }
  0x1a   :  { %374 = vmatprep.subr.bf16.mxu1 %v341_v8  ;;  %v365_v26 = vpack.c.bf16 %v57_v25, %v56_v24  ;;  %p437_p11 = por %p436_p10, %p435_p9 }
  0x1c   :  { %344 = vmatpush3.bf16.msra.mxu0 %v341_v8  ;;  %p438_p12 = pnand %p437_p11, %p431_p8 }
  0x1d   :  { %346 = vmatprep.subr.bf16.mxu0 %v345_v11 }
  0x20   :  { %348 = vmatpush3.bf16.msra.mxu0 %v345_v11  ;;  %376 = vmatpush3.bf16.xpose.msra.mxu1 %v341_v8 }
  0x21   :  { %350 = vmatprep.subr.bf16.mxu0 %v349_v14  ;;  %378 = vmatprep.subr.bf16.mxu1 %v345_v11 }
  0x24   :  { %352 = vmatpush3.bf16.msra.mxu0 %v349_v14 }
  0x25   :  { %354 = vmatprep.subr.bf16.mxu0 %v353_v17 }
  0x28   :  { %356 = vmatpush3.bf16.msra.mxu0 %v353_v17  ;;  %380 = vmatpush3.bf16.xpose.msra.mxu1 %v345_v11 }
  0x29   :  { %358 = vmatprep.subr.bf16.mxu0 %v357_v20  ;;  %382 = vmatprep.subr.bf16.mxu1 %v349_v14 }
  0x2c   :  { %360 = vmatpush3.bf16.msra.mxu0 %v357_v20 }
  0x2d   :  { %362 = vmatprep.subr.bf16.mxu0 %v361_v23 }
  0x30   :  { %364 = vmatpush3.bf16.msra.mxu0 %v361_v23  ;;  %384 = vmatpush3.bf16.xpose.msra.mxu1 %v349_v14 }
  0x31   :  { %366 = vmatprep.subr.bf16.mxu0 %v365_v26  ;;  %386 = vmatprep.subr.bf16.mxu1 %v353_v17 }
  0x34   :  { %368 = vmatpush3.bf16.msra.mxu0 %v365_v26 }
  0x38   :  { %388 = vmatpush3.bf16.xpose.msra.mxu1 %v353_v17 }
  0x39   :  { %390 = vmatprep.subr.bf16.mxu1 %v357_v20 }
  0x40   :  { %392 = vmatpush3.bf16.xpose.msra.mxu1 %v357_v20 }
  0x41   :  { %394 = vmatprep.subr.bf16.mxu1 %v361_v23 }
  0x48   :  { %396 = vmatpush3.bf16.xpose.msra.mxu1 %v361_v23 }
  0x49   :  { %398 = vmatprep.subr.bf16.mxu1 %v365_v26 }
  0x50   :  { %400 = vmatpush3.bf16.xpose.msra.mxu1 %v365_v26 }
  0x94   :  { %v32_v29 = vpop.permute.xlu0 %31 }
  0x95   :  { %vm36_vm0 = vcmp.eq.s32.totalorder %v27_v28, %v32_v29 }
  0x96   :  { %299 = vmatprep.mubr.msk.f32.mxu0 %vm36_vm0, %v460_v30 }
  0x98   :  { %v35_v31 = vpop.permute.xlu0 %34 }
  0x99   :  { %vm37_vm1 = vcmp.eq.s32.totalorder %v27_v28, %v35_v31 }
  0x9a   :  { %300 = vmatmul.mubr.msk.f32.vlgmr.msra.gmra.mrb[0].mxu0 %vm37_vm1, %v460_v30 }
 0x16d   :  { %v301_v32 = vpop.f32.mrb[0].mxu0 }
 0x16e   :  { %v124_v33 = vpop.f32.mrb[1].mxu0 }
 0x16f   :  { %334 = vmatprep.mubr.f32.mxu1 %v124_v33 }
 0x170   :  { %335 = vmatmul.mubr.f32.vlgmr.msra.gmra.mrb[0].mxu1 %v301_v32 }
 0x243   :  { %v336_v34 = vpop.f32.mrb[0].mxu1 }
 0x244   :  { %209 = vst [vmem:[#allocation5 + $0x8] sm:$0xff] %v336_v34  ;;  %v199_v35 = vpop.f32.mrb[1].mxu1 }
 0x245   :  { %208 = vst [vmem:[#allocation5] sm:$0xff] %v199_v35 }
 0x246   :  { %441 = shalt.err (!%p438_p12)
}
 0x247   :  { %s442_s30 = scalar_lea.hbm %s515_s2, 256 }
 0x248   :  { %p443_p13 = scmp.ne.s32.totalorder %s515_s2, %s442_s30  ;;  %p446_p0 = scmp.lt.u32.totalorder %s442_s30, %s515_s2 }
 0x24a   :  { %p448_p1 = pnand %p446_p0, %p443_p13 }
 0x24c   :  { %451 = shalt.err (!%p448_p1)
}
 0x24d   :  { %221 = dma.vmem_to_hbm [thread:$0]  %s216_s1, 256, %s515_s2, [#allocation4], %s457_s19, %s457_s19, %s458_s20  }
 0x24e   :  { %454 = dma.done.wait [#allocation4], 256  }
 0x24f   :  { %455 = vsyncadd [#allocation4], 4294967040 }
 0x250   :  { %225 = vsyncpa [#allocation3], 1 }
 0x251   :  { %226 = vsyncpa [#allocation4], 1 }

</bundles_post_ra>
